<compile_context>
chip_gen: v6e
topology: v6e:2x2x1
jax: 0.10.0
libtpu: 0.0.40
codegen_flags: <defaults>
</compile_context>

<pallas_src>
import jax
import jax.numpy as jnp
from jax.experimental import pallas as pl
from jax.experimental.pallas import tpu as pltpu


def _make_swish_kernel(compute_dtype):
    def _swish_kernel(x_ref, o_ref):
        x = x_ref[...].astype(compute_dtype)
        # sigmoid -> EUP, multiply -> VPU; both fully hidden under DMA once
        # blocks are multi-MiB.
        o_ref[...] = (jax.nn.sigmoid(x) * x).astype(o_ref.dtype)
    return _swish_kernel


def _tpu_vmem_bytes() -> int:
    """Physical VMEM of the current chip (fallback: 128 MiB, v5e/v6e-like)."""
    try:
        return int(pltpu.get_tpu_info().vmem_capacity_bytes)
    except Exception:
        return 128 * 1024 * 1024


def _choose_layout(total: int):
    """Pick a lane-dense column width C (multiple of 128) and required tail pad."""
    for c in (8192, 4096, 2048, 1024, 512, 256, 128):
        if total % c == 0:
            return c, 0
    c = 1024 if total >= 1024 else 128
    pad = (-total) % c
    return c, pad


def swish(x: jax.Array, *, target_block_bytes: int = 4 * 1024 * 1024) -> jax.Array:
    """Elementwise swish via Pallas. Accepts any rank/shape."""
    orig_shape = x.shape
    total = x.size
    if total == 0:
        return x

    itemsize = jnp.dtype(x.dtype).itemsize

    # --- lane-dense 2-D packing -------------------------------------------
    cols, pad = _choose_layout(total)
    flat = x.reshape(-1)
    if pad:
        flat = jnp.concatenate([flat, jnp.zeros((pad,), dtype=x.dtype)])
    rows = flat.size // cols
    x2 = flat.reshape(rows, cols)

    # --- block sizing (bytes-based, generation-aware) ----------------------
    phys_vmem = _tpu_vmem_bytes()
    # ~4 MiB blocks on 128 MiB-VMEM chips, automatically smaller on v7x (64 MiB).
    blk_bytes = min(target_block_bytes, max(phys_vmem // 16, 1 * 1024 * 1024))
    row_bytes = cols * itemsize
    br = max(1, blk_bytes // row_bytes)
    if br < rows:
        br = max(8, (br // 8) * 8)      # keep the (8,128) tiling rule happy
    br = min(br, rows)

    # Keep at least ~4 grid blocks on big inputs so megacore (2 TCs on v7x)
    # has work on every core.
    if rows >= 32 and pl.cdiv(rows, br) < 4:
        br = max(8, (pl.cdiv(rows, 4) // 8) * 8)
        br = min(br, rows)

    grid = (pl.cdiv(rows, br),)

    # bf16 computes natively (bf16 VPU/EUP on v6e/v7x); everything else in f32.
    compute_dtype = x.dtype if x.dtype in (jnp.float32, jnp.bfloat16) else jnp.float32

    # 2 pipeline buffers x (in + out) x block, plus headroom for intermediates.
    vmem_limit = int(min(phys_vmem // 2, 64 * 1024 * 1024))

    out = pl.pallas_call(
        _make_swish_kernel(compute_dtype),
        out_shape=jax.ShapeDtypeStruct((rows, cols), x.dtype),
        grid=grid,
        in_specs=[pl.BlockSpec((br, cols), lambda i: (i, 0))],
        out_specs=pl.BlockSpec((br, cols), lambda i: (i, 0)),
        compiler_params=pltpu.CompilerParams(
            dimension_semantics=("parallel",),
            vmem_limit_bytes=vmem_limit,
        ),
    )(x2)

    flat_out = out.reshape(-1)
    if pad:
        flat_out = flat_out[:total]
    return flat_out.reshape(orig_shape)


if __name__ == "__main__":
    key = jax.random.PRNGKey(0)

    # Shape consistent with an MLP hidden activation (batch=16, hidden=128).
    x = jax.random.normal(key, (16, 128), dtype=jnp.float32)
    y = swish(x)
    jax.block_until_ready(y)
    y_ref = jax.nn.sigmoid(x) * x
    assert jnp.allclose(y, y_ref, atol=1e-5, rtol=1e-5), "mismatch vs reference (16,128)"

    # Ragged shape that exercises the pad/repack path.
    x2 = jax.random.normal(jax.random.PRNGKey(1), (4, 37), dtype=jnp.float32)
    y2 = swish(x2)
    jax.block_until_ready(y2)
    y2_ref = jax.nn.sigmoid(x2) * x2
    assert jnp.allclose(y2, y2_ref, atol=1e-5, rtol=1e-5), "mismatch vs reference (4,37)"

    print("KERNEL_OK")
</pallas_src>

<mosaic_0001>
module attributes {stable_mosaic.version = 11 : i64} {
  func.func @_swish_kernel(%arg0: i32, %arg1: memref<1x2048xf32, #tpu.memory_space<vmem>>, %arg2: memref<1x2048xf32, #tpu.memory_space<vmem>>) attributes {dimension_semantics = [#tpu.dimension_semantics<parallel>], iteration_bounds = array<i64: 1>, scalar_prefetch = 0 : i64, scratch_operands = 0 : i64, tpu.core_type = #tpu.core_type<tc>, window_params = [{transform_indices = @transform_0, window_bounds = array<i64: 1, 2048>}, {transform_indices = @transform_1, window_bounds = array<i64: 1, 2048>}]} {
    %c0 = arith.constant 0 : index
    %c0_0 = arith.constant 0 : index
    %0 = vector.load %arg1[%c0, %c0_0] : memref<1x2048xf32, #tpu.memory_space<vmem>>, vector<1x2048xf32>
    %1 = arith.negf %0 : vector<1x2048xf32>
    %2 = math.exp %1 : vector<1x2048xf32>
    %cst = arith.constant 1.000000e+00 : f32
    %3 = vector.broadcast %cst : f32 to vector<1x2048xf32>
    %4 = arith.addf %3, %2 : vector<1x2048xf32>
    %5 = arith.divf %3, %4 : vector<1x2048xf32>
    %6 = arith.mulf %5, %0 : vector<1x2048xf32>
    %c0_1 = arith.constant 0 : index
    %c0_2 = arith.constant 0 : index
    %7 = vector.load %arg2[%c0_1, %c0_2] : memref<1x2048xf32, #tpu.memory_space<vmem>>, vector<1x2048xf32>
    tpu.vector_store %arg2[%c0_1, %c0_2], %6 {strides = array<i32>} : memref<1x2048xf32, #tpu.memory_space<vmem>>, vector<1x2048xf32>,
    return
  }
  func.func @transform_0(%arg0: i32) -> (i32, i32) {
    %c0_i32 = arith.constant 0 : i32
    %c0_i32_0 = arith.constant 0 : i32
    return %arg0, %c0_i32 : i32, i32
  }
  func.func @transform_1(%arg0: i32) -> (i32, i32) {
    %c0_i32 = arith.constant 0 : i32
    %c0_i32_0 = arith.constant 0 : i32
    return %arg0, %c0_i32 : i32, i32
  }
}

</mosaic_0001>

<bundles_post_ra>
// kernel: tpu_custom_call.1
= control target key start
LH: loop header
LB: loop body
LE: loop exit
PB: predicated region body
PF: predicated region fallthrough
CT: control target
= control target key end

     0   :  { %6 = vsyncpa [#allocation3], 0  ;;  %s128_s0 = inlined_call_operand.hbm [shape: f32[1,2048], index: 0, kind: input, shape index: {}]   ;;  %s129_s1 = inlined_call_operand.hbm [shape: f32[1,2048], index: 1, kind: output, shape index: {}]  }
   0x1   :  { %7 = vsyncpa [#allocation4], 0  ;;  %s110_s6 = smov [#allocation2]  }
   0x2   :  { %s14_s7 = sshll.u32 %s110_s6, 4  ;;  %s15_s7 = int_to_ptr.vmem [resolvable:$true] %s14_s7 }
   0x3   :  { %s74_s8 = scalar_lea.vmem %s15_s7, 256  ;;  %p79_p1 = scmp.lt.s32.totalorder %s15_s7, %s15_s7 }
   0x4   :  { %p75_p0 = scmp.ne.s32.totalorder %s15_s7, %s74_s8  ;;  %p80_p2 = scmp.lt.s32.totalorder %s74_s8, %s74_s8 }
   0x6   :  { %p81_p3 = por %p80_p2, %p79_p1 }
   0x8   :  { %p82_p4 = pnand %p81_p3, %p75_p0 }
   0xa   :  { %85 = shalt.err (!%p82_p4)
}
   0xb   :  { %17 = dma.hbm_to_vmem [thread:$0]  %s128_s0, 256, %s15_s7, [#allocation3]  }
   0xc   :  { %106 = dma.done.wait [#allocation3], 256  }
   0xd   :  { %107 = vsyncadd [#allocation3], 4294967040  ;;  %v21_v0 = vld [vmem:[#allocation2] sm:$0xff]  ;;  %v22_v1 = vld [vmem:[#allocation2 + $0x8] sm:$0xff]  ;;  %s111_s11 = smov [#allocation5]  }
   0xe   :  { %v54_v2 = vmul.f32 -1.442695, %v21_v0  ;;  %v55_v3 = vmul.f32 -1.442695, %v22_v1  ;;  %s45_s12 = sshll.u32 %s111_s11, 4  ;;  %s46_s12 = int_to_ptr.vmem [resolvable:$true] %s45_s12 }
   0xf   :  { %s86_s0 = scalar_lea.vmem %s46_s12, 256  ;;  %p91_p6 = scmp.lt.s32.totalorder %s46_s12, %s46_s12 }
  0x10   :  { %58 = vpow2.f32 %v54_v2  ;;  %p87_p5 = scmp.ne.s32.totalorder %s46_s12, %s86_s0  ;;  %p92_p7 = scmp.lt.s32.totalorder %s86_s0, %s86_s0 }
  0x11   :  { %60 = vpow2.f32 %v55_v3 }
  0x12   :  { %p93_p8 = por %p92_p7, %p91_p6 }
  0x14   :  { %p94_p9 = pnand %p93_p8, %p87_p5 }
  0x1d   :  { %v59_v4 = vpop.eup %58 }
  0x1e   :  { %v61_v5 = vpop.eup %60  ;;  %v29_v6 = vadd.f32 1.0, %v59_v4 }
  0x1f   :  { %v30_v7 = vadd.f32 1.0, %v61_v5 }
  0x20   :  { %62 = vrcp.f32 %v29_v6 }
  0x21   :  { %64 = vrcp.f32 %v30_v7 }
  0x2d   :  { %v63_v8 = vpop.eup %62 }
  0x2e   :  { %v65_v9 = vpop.eup %64  ;;  %v35_v10 = vmul.f32 %v63_v8, %v21_v0 }
  0x2f   :  { %v36_v11 = vmul.f32 %v65_v9, %v22_v1 }
  0x30   :  { %37 = vst [vmem:[#allocation5] sm:$0xff] %v35_v10 }
  0x31   :  { %38 = vst [vmem:[#allocation5 + $0x8] sm:$0xff] %v36_v11 }
  0x32   :  { %97 = shalt.err (!%p94_p9)
}
  0x33   :  { %48 = dma.vmem_to_hbm [thread:$0]  %s46_s12, 256, %s129_s1, [#allocation4]  }
  0x34   :  { %108 = dma.done.wait [#allocation4], 256  }
  0x35   :  { %109 = vsyncadd [#allocation4], 4294967040 }
  0x36   :  { %52 = vsyncpa [#allocation3], 1 }
  0x37   :  { %53 = vsyncpa [#allocation4], 1 }

</bundles_post_ra>
